<compile_context>
chip_gen: v5e
topology: v5e:2x2
jax: 0.10.0
libtpu: 0.0.40
codegen_flags: <defaults>
</compile_context>

<pallas_src>
import jax
import jax.numpy as jnp
from jax.experimental import pallas as pl
from jax.experimental.pallas import tpu as pltpu


def _proj_kernel(x_ref, w_ref, b_ref, o_ref):
    # x_ref: (TM, Kp)  w_ref: (Kp, Np)  b_ref: (1, Np) f32  o_ref: (TM, Np)
    acc = jnp.dot(x_ref[...], w_ref[...], preferred_element_type=jnp.float32)
    o_ref[...] = (acc + b_ref[...]).astype(o_ref.dtype)


def _round_up(x: int, m: int) -> int:
    return ((x + m - 1) // m) * m


def _sublane_tile(dtype) -> int:
    # 8 for 32-bit, 16 for 16-bit, 32 for 8-bit dtypes.
    return max(8, 32 // jnp.dtype(dtype).itemsize)


def _choose_group(out_dim: int) -> int:
    # Pack G original rows per packed row so the output width is 128 lanes.
    if out_dim <= 128 and 128 % out_dim == 0:
        return 128 // out_dim
    return 1


def _choose_tm(m_packed: int, sublane: int) -> int:
    # ~4 MiB of f32 x per grid step at 256-wide packing (32K original rows);
    # double-buffered x+out stays ~12 MiB -> fits every generation's VMEM.
    MAX_TM = 4096
    if m_packed <= 4 * sublane:
        return m_packed                      # tiny input: one full-extent tile
    # Aim for >= 4 grid steps (pipelining + megacore split), cap per-step VMEM.
    tm = _round_up(pl.cdiv(m_packed, 4), sublane)
    return min(MAX_TM, tm)


@jax.jit
def proj_net_linear(audio_feat, weight, bias):
    """Pallas implementation of Proj_net.forward (projection_type='Linear').

    audio_feat: (B, S, in_dim)
    weight:     (in_dim, out_dim)   (== torch nn.Linear.weight transposed)
    bias:       (out_dim,)
    returns:    (B, S, out_dim)
    """
    B, S, in_dim = audio_feat.shape
    k_dim, out_dim = weight.shape
    assert k_dim == in_dim, "weight must be (in_dim, out_dim)"
    M = B * S

    G = _choose_group(out_dim)
    Kp, Np = G * in_dim, G * out_dim

    x2d = audio_feat.reshape(M, in_dim)
    M_g = _round_up(M, G)
    if M_g != M:
        # Pad at most G-1 rows so the zero-copy (M,in)->(M/G,G*in) view exists.
        # (Never pad to a multiple of TM -- the ragged grid tail is masked.)
        x2d = jnp.pad(x2d, ((0, M_g - M), (0, 0)))
    M_packed = M_g // G
    x_packed = x2d.reshape(M_packed, Kp)        # zero-copy row-major reshape

    # Block-diagonal weight: [x_0|...|x_{G-1}] @ W_bd = [x_0 W|...|x_{G-1} W].
    w_bd = jnp.kron(jnp.eye(G, dtype=weight.dtype), weight)       # (Kp, Np)
    b_bd = jnp.tile(bias.astype(jnp.float32), G).reshape(1, Np)   # f32 once

    TM = _choose_tm(M_packed, _sublane_tile(audio_feat.dtype))
    num_tiles = pl.cdiv(M_packed, TM)           # ragged tail handled by Pallas

    dtype_bytes = jnp.dtype(audio_feat.dtype).itemsize
    cost = pl.CostEstimate(
        flops=2 * M_packed * Kp * Np,
        transcendentals=0,
        bytes_accessed=(M_packed * Kp + Kp * Np + M_packed * Np) * dtype_bytes
                       + Np * 4,
    )

    out_packed = pl.pallas_call(
        _proj_kernel,
        out_shape=jax.ShapeDtypeStruct((M_packed, Np), audio_feat.dtype),
        grid_spec=pl.GridSpec(
            grid=(num_tiles,),
            in_specs=[
                # x: one (TM, Kp) tile per grid step (double-buffered by Pallas).
                pl.BlockSpec((TM, Kp), lambda i: (i, 0)),
                # weight / bias: constant block index -> VMEM-resident.
                pl.BlockSpec((Kp, Np), lambda i: (0, 0)),
                pl.BlockSpec((1, Np), lambda i: (0, 0)),
            ],
            out_specs=pl.BlockSpec((TM, Np), lambda i: (i, 0)),
        ),
        compiler_params=pltpu.CompilerParams(
            dimension_semantics=("parallel",),
            vmem_limit_bytes=32 * 1024 * 1024,
        ),
        cost_estimate=cost,
    )(x_packed, w_bd, b_bd)

    out2d = out_packed.reshape(M_g, out_dim)    # zero-copy row-major reshape
    if M_g != M:
        out2d = out2d[:M]
    return out2d.reshape(B, S, out_dim)


if __name__ == "__main__":
    # Small shapes consistent with Proj_net('Linear'):
    #   audio_feat: (batch=2, seq=8, in_dim=32) -> out: (2, 8, out_dim=16)
    B, S, in_dim, out_dim = 2, 8, 32, 16

    key = jax.random.PRNGKey(0)
    kx, kw, kb = jax.random.split(key, 3)

    audio_feat = jax.random.normal(kx, (B, S, in_dim), dtype=jnp.float32)

    # nn.Linear-style init: U(-1/sqrt(in_dim), 1/sqrt(in_dim)).
    # NOTE: weight is (in_dim, out_dim) == torch nn.Linear.weight transposed.
    bound = 1.0 / (in_dim ** 0.5)
    weight = jax.random.uniform(kw, (in_dim, out_dim), jnp.float32, -bound, bound)
    bias = jax.random.uniform(kb, (out_dim,), jnp.float32, -bound, bound)

    # audio_len is accepted by the PyTorch forward but unused in the Linear path.
    out = proj_net_linear(audio_feat, weight, bias)
    jax.block_until_ready(out)

    ref = audio_feat @ weight + bias
    assert out.shape == (B, S, out_dim)
    assert jnp.allclose(out, ref, atol=1e-5, rtol=1e-5)

    # Also exercise a larger, non-divisible M (covers repack pad + ragged-tail
    # grid + multi-tile pipelined path).
    B2, S2 = 3, 777   # M = 2331 -> pad 5 rows to 2336, 292 packed rows, 4 tiles
    audio_feat2 = jax.random.normal(jax.random.PRNGKey(1), (B2, S2, in_dim),
                                    dtype=jnp.float32)
    out2 = proj_net_linear(audio_feat2, weight, bias)
    jax.block_until_ready(out2)
    ref2 = audio_feat2 @ weight + bias
    assert out2.shape == (B2, S2, out_dim)
    assert jnp.allclose(out2, ref2, atol=1e-5, rtol=1e-5)

    # TODO(synk): non-'Linear' projection_type requires an external Transformer
    # (TransformerModels.*) + CLS-token path not defined in this module; only
    # the Linear projection path is implemented.
    print("KERNEL_OK")
</pallas_src>

<mosaic_0001>
module attributes {stable_mosaic.version = 11 : i64} {
  func.func @_proj_kernel(%arg0: i32, %arg1: memref<2x256xf32, #tpu.memory_space<vmem>>, %arg2: memref<256x128xf32, #tpu.memory_space<vmem>>, %arg3: memref<1x128xf32, #tpu.memory_space<vmem>>, %arg4: memref<2x128xf32, #tpu.memory_space<vmem>>) attributes {dimension_semantics = [#tpu.dimension_semantics<parallel>], iteration_bounds = array<i64: 1>, scalar_prefetch = 0 : i64, scratch_operands = 0 : i64, tpu.core_type = #tpu.core_type<tc>, window_params = [{transform_indices = @transform_0, window_bounds = array<i64: 2, 256>}, {pipeline_mode = #tpu.pipeline_mode<synchronous>, transform_indices = @transform_1, window_bounds = array<i64: 256, 128>}, {pipeline_mode = #tpu.pipeline_mode<synchronous>, transform_indices = @transform_2, window_bounds = array<i64: 1, 128>}, {transform_indices = @transform_3, window_bounds = array<i64: 2, 128>}]} {
    %c0 = arith.constant 0 : index
    %c0_0 = arith.constant 0 : index
    %0 = vector.load %arg1[%c0, %c0_0] : memref<2x256xf32, #tpu.memory_space<vmem>>, vector<2x256xf32>
    %c0_1 = arith.constant 0 : index
    %c0_2 = arith.constant 0 : index
    %1 = vector.load %arg2[%c0_1, %c0_2] : memref<256x128xf32, #tpu.memory_space<vmem>>, vector<256x128xf32>
    %cst = arith.constant dense<0.000000e+00> : vector<2x128xf32>
    %2 = tpu.matmul %0, %1, %cst {dimension_numbers = #tpu.dot_dimension_numbers<[1], [0], [0], [1], [0, 0, 1, 1], [], []>} : vector<2x256xf32>, vector<256x128xf32>, vector<2x128xf32> -> vector<2x128xf32>
    %c0_3 = arith.constant 0 : index
    %c0_4 = arith.constant 0 : index
    %3 = vector.load %arg3[%c0_3, %c0_4] : memref<1x128xf32, #tpu.memory_space<vmem>>, vector<1x128xf32>
    %4 = vector.broadcast %3 : vector<1x128xf32> to vector<2x128xf32>
    %5 = arith.addf %2, %4 : vector<2x128xf32>
    %c0_5 = arith.constant 0 : index
    %c0_6 = arith.constant 0 : index
    %6 = vector.load %arg4[%c0_5, %c0_6] : memref<2x128xf32, #tpu.memory_space<vmem>>, vector<2x128xf32>
    tpu.vector_store %arg4[%c0_5, %c0_6], %5 {strides = array<i32>} : memref<2x128xf32, #tpu.memory_space<vmem>>, vector<2x128xf32>,
    return
  }
  func.func @transform_0(%arg0: i32) -> (i32, i32) {
    %c0_i32 = arith.constant 0 : i32
    %c0_i32_0 = arith.constant 0 : i32
    return %arg0, %c0_i32 : i32, i32
  }
  func.func @transform_1(%arg0: i32) -> (i32, i32) {
    %c0_i32 = arith.constant 0 : i32
    %c0_i32_0 = arith.constant 0 : i32
    %c0_i32_1 = arith.constant 0 : i32
    return %c0_i32, %c0_i32_0 : i32, i32
  }
  func.func @transform_2(%arg0: i32) -> (i32, i32) {
    %c0_i32 = arith.constant 0 : i32
    %c0_i32_0 = arith.constant 0 : i32
    %c0_i32_1 = arith.constant 0 : i32
    return %c0_i32, %c0_i32_0 : i32, i32
  }
  func.func @transform_3(%arg0: i32) -> (i32, i32) {
    %c0_i32 = arith.constant 0 : i32
    %c0_i32_0 = arith.constant 0 : i32
    return %arg0, %c0_i32 : i32, i32
  }
}

</mosaic_0001>

<bundles_post_ra>
// kernel: tile.8
= control target key start
LH: loop header
LB: loop body
LE: loop exit
PB: predicated region body
PF: predicated region fallthrough
CT: control target
= control target key end

     0   :  { %s22_s0 = inlined_call_operand.vmem [shape: f32[16], index: 0, kind: input, shape index: {}]   ;;  %s23_s1 = inlined_call_operand.vmem [shape: f32[8,16], index: 1, kind: output, shape index: {}]  }
   0x1   :  { %v4_v0 = vld [vmem:[%s22_s0] ss:$0 sm:$0xff] }
   0x2   :  { %5 = vst [vmem:[%s23_s1] sm:$0xff] %v4_v0 }

// kernel: tile.9
= control target key start
LH: loop header
LB: loop body
LE: loop exit
PB: predicated region body
PF: predicated region fallthrough
CT: control target
= control target key end

     0   :  { %s67_s10 = smov 112   ;;  %s68_s11 = smov 80   ;;  %vm3_vm0 = vcmask 130048   ;;  %vm9_vm1 = vcmask 1048448   ;;  %vm15_vm2 = vcmask 917248   ;;  %vm21_vm3 = vcmask 786048   ;;  %s111_s0 = inlined_call_operand.vmem [shape: f32[8,16], index: 0, kind: input, shape index: {}]   ;;  %s112_s1 = inlined_call_operand.vmem [shape: f32[1,128], index: 1, kind: output, shape index: {}]  }
   0x1   :  { %v53_v0 = vld [vmem:[%s111_s0 + $0x7] sm:$0x1]   ;;  %v55_v1 = vld [vmem:[%s111_s0 + $0x5] sm:$0x1]   ;;  %v57_v2 = vld [vmem:[%s111_s0 + $0x3] sm:$0x1]  }
   0x2   :  { %7 = vrot.lane.b32.xlu0 %v53_v0, %s67_s10  ;;  %19 = vrot.lane.b32.xlu1 %v55_v1, %s68_s11  ;;  %s69_s14 = smov 48   ;;  %v54_v3 = vld [vmem:[%s111_s0 + $0x6] sm:$0x1]   ;;  %v56_v4 = vld [vmem:[%s111_s0 + $0x4] sm:$0x1]   ;;  %s70_s21 = smov 96  }
   0x3   :  { %31 = vrot.lane.b32.xlu2 %v57_v2, %s69_s14  ;;  %v58_v5 = vld [vmem:[%s111_s0 + $0x2] sm:$0x1]   ;;  %s71_s22 = smov 64   ;;  %s72_s23 = smov 32   ;;  %v59_v6 = vld [vmem:[%s111_s0 + $0x1] sm:$0x1]  }
   0x4   :  { %s73_s26 = smov 16   ;;  %v2_v7 = vld [vmem:[%s111_s0] sm:$0x1]   ;;  %vm27_vm4 = vcmask 654848   ;;  %vm33_vm5 = vcmask 523648   ;;  %vm39_vm6 = vcmask 392448  }
   0x5   :  { %4 = vst.msk [vmem:[#allocation0] sm:$0x1] %vm3_vm0, %v2_v7   ;;  %vm45_vm7 = vcmask 261248  }
   0xa   :  { %13 = vrot.lane.b32.xlu0 %v54_v3, %s70_s21  ;;  %25 = vrot.lane.b32.xlu1 %v56_v4, %s71_s22 }
   0xb   :  { %37 = vrot.lane.b32.xlu2 %v58_v5, %s72_s23 }
  0x12   :  { %43 = vrot.lane.b32.xlu0 %v59_v6, %s73_s26 }
  0x5d   :  { %v32_v8 = vpop.permute.xlu2 %31  }
  0x65   :  { %v38_v9 = vpop.permute.xlu2 %37  }
  0x74   :  { %v8_v10 = vpop.permute.xlu0 %7   ;;  %v20_v11 = vpop.permute.xlu1 %19  }
  0x75   :  { %10 = vst.msk [vmem:[#allocation0] sm:$0x1] %vm9_vm1, %v8_v10  }
  0x7c   :  { %v14_v12 = vpop.permute.xlu0 %13   ;;  %v26_v13 = vpop.permute.xlu1 %25  }
  0x7d   :  { %16 = vst.msk [vmem:[#allocation0] sm:$0x1] %vm15_vm2, %v14_v12  }
  0x7e   :  { %22 = vst.msk [vmem:[#allocation0] sm:$0x1] %vm21_vm3, %v20_v11  }
  0x7f   :  { %28 = vst.msk [vmem:[#allocation0] sm:$0x1] %vm27_vm4, %v26_v13  }
  0x80   :  { %34 = vst.msk [vmem:[#allocation0] sm:$0x1] %vm33_vm5, %v32_v8  }
  0x81   :  { %40 = vst.msk [vmem:[#allocation0] sm:$0x1] %vm39_vm6, %v38_v9  }
  0x84   :  { %v44_v14 = vpop.permute.xlu0 %43  }
  0x85   :  { %46 = vst.msk [vmem:[#allocation0] sm:$0x1] %vm45_vm7, %v44_v14  }
  0x8c   :  { %v49_v15 = vld [vmem:[#allocation0] sm:$0x1] }
  0x8d   :  { %52 = vst [vmem:[%s112_s1] sm:$0x1] %v49_v15 }

// kernel: proj_net_linear.1
= control target key start
LH: loop header
LB: loop body
LE: loop exit
PB: predicated region body
PF: predicated region fallthrough
CT: control target
= control target key end

     0   :  { %s228_s1 = inlined_call_operand.vmem [shape: f32[256,128], index: 1, kind: input, shape index: {}]   ;;  %s229_s0 = inlined_call_operand.vmem [shape: f32[2,256], index: 0, kind: input, shape index: {}]   ;;  %s230_s2 = inlined_call_operand.vmem [shape: f32[1,128], index: 2, kind: input, shape index: {}]   ;;  %s231_s3 = inlined_call_operand.vmem [shape: f32[2,128], index: 3, kind: output, shape index: {}]  }
   0x1   :  { %v30_v0 = vld [vmem:[%s228_s1 + $0x78] sm:$0xff]  ;;  %v29_v1 = vld [vmem:[%s228_s1 + $0x70] sm:$0xff]  ;;  %v28_v4 = vld [vmem:[%s228_s1 + $0x68] sm:$0xff] }
   0x2   :  { %v46_v2 = vld [vmem:[%s228_s1 + $0xf8] sm:$0xff]  ;;  %57 = vmatpush.msra.mxu0 %v30_v0  ;;  %v45_v3 = vld [vmem:[%s228_s1 + $0xf0] sm:$0xff]  ;;  %v44_v5 = vld [vmem:[%s228_s1 + $0xe8] sm:$0xff] }
   0x3   :  { %77 = vmatpush.msra.mxu1 %v46_v2  ;;  %v27_v6 = vld [vmem:[%s228_s1 + $0x60] sm:$0xff]  ;;  %v26_v8 = vld [vmem:[%s228_s1 + $0x58] sm:$0xff]  ;;  %v25_v10 = vld [vmem:[%s228_s1 + $0x50] sm:$0xff] }
   0x4   :  { %58 = vmatpush.msra.mxu0 %v29_v1  ;;  %v43_v7 = vld [vmem:[%s228_s1 + $0xe0] sm:$0xff]  ;;  %v42_v9 = vld [vmem:[%s228_s1 + $0xd8] sm:$0xff]  ;;  %v41_v11 = vld [vmem:[%s228_s1 + $0xd0] sm:$0xff] }
   0x5   :  { %78 = vmatpush.msra.mxu1 %v45_v3  ;;  %v24_v12 = vld [vmem:[%s228_s1 + $0x48] sm:$0xff]  ;;  %v14_v14 = vld [vmem:[%s229_s0] sm:$0xf]  ;;  %v22_v17 = vld [vmem:[%s228_s1 + $0x38] sm:$0xff] }
   0x6   :  { %59 = vmatpush.msra.mxu0 %v28_v4  ;;  %v40_v13 = vld [vmem:[%s228_s1 + $0xc8] sm:$0xff]  ;;  %52 = vst [vmem:[#allocation1] ss:$4 sm:$0xff] %v14_v14  ;;  %v23_v15 = vld [vmem:[%s228_s1 + $0x40] sm:$0xff]  ;;  %v38_v18 = vld [vmem:[%s228_s1 + $0xb8] sm:$0xff] }
   0x7   :  { %79 = vmatpush.msra.mxu1 %v44_v5  ;;  %v39_v16 = vld [vmem:[%s228_s1 + $0xc0] sm:$0xff]  ;;  %v21_v19 = vld [vmem:[%s228_s1 + $0x30] sm:$0xff]  ;;  %v20_v21 = vld [vmem:[%s228_s1 + $0x28] sm:$0xff] }
   0x8   :  { %60 = vmatpush.msra.mxu0 %v27_v6  ;;  %v37_v20 = vld [vmem:[%s228_s1 + $0xb0] sm:$0xff]  ;;  %v36_v22 = vld [vmem:[%s228_s1 + $0xa8] sm:$0xff]  ;;  %v19_v23 = vld [vmem:[%s228_s1 + $0x20] sm:$0xff] }
   0x9   :  { %80 = vmatpush.msra.mxu1 %v43_v7  ;;  %v35_v24 = vld [vmem:[%s228_s1 + $0xa0] sm:$0xff]  ;;  %v18_v25 = vld [vmem:[%s228_s1 + $0x18] sm:$0xff]  ;;  %v17_v27 = vld [vmem:[%s228_s1 + $0x10] sm:$0xff] }
   0xa   :  { %61 = vmatpush.msra.mxu0 %v26_v8  ;;  %v34_v26 = vld [vmem:[%s228_s1 + $0x98] sm:$0xff]  ;;  %v33_v28 = vld [vmem:[%s228_s1 + $0x90] sm:$0xff]  ;;  %v16_v29 = vld [vmem:[%s228_s1 + $0x8] sm:$0xff] }
   0xb   :  { %81 = vmatpush.msra.mxu1 %v42_v9  ;;  %v32_v30 = vld [vmem:[%s228_s1 + $0x88] sm:$0xff]  ;;  %v15_v31 = vld [vmem:[%s228_s1] sm:$0xff] }
   0xc   :  { %62 = vmatpush.msra.mxu0 %v25_v10  ;;  %v31_v32 = vld [vmem:[%s228_s1 + $0x80] sm:$0xff] }
   0xd   :  { %82 = vmatpush.msra.mxu1 %v41_v11  ;;  %v53_v33 = vld.sshfl [vmem:[#allocation1] sm:$0xff pattern:$0x73625140]  ;;  %v54_v34 = vld.sshfl [vmem:[#allocation1 + $0x8] sm:$0xff pattern:$0x73625140] }
   0xe   :  { %63 = vmatpush.msra.mxu0 %v24_v12  ;;  %v102_v35 = vld [vmem:[%s230_s2] ss:$0 sm:$0xff] }
   0xf   :  { %83 = vmatpush.msra.mxu1 %v40_v13 }
  0x10   :  { %64 = vmatpush.msra.mxu0 %v23_v15 }
  0x11   :  { %84 = vmatpush.msra.mxu1 %v39_v16 }
  0x12   :  { %65 = vmatpush.msra.mxu0 %v22_v17 }
  0x13   :  { %85 = vmatpush.msra.mxu1 %v38_v18 }
  0x14   :  { %66 = vmatpush.msra.mxu0 %v21_v19 }
  0x15   :  { %86 = vmatpush.msra.mxu1 %v37_v20 }
  0x16   :  { %67 = vmatpush.msra.mxu0 %v20_v21 }
  0x17   :  { %87 = vmatpush.msra.mxu1 %v36_v22 }
  0x18   :  { %68 = vmatpush.msra.mxu0 %v19_v23 }
  0x19   :  { %88 = vmatpush.msra.mxu1 %v35_v24 }
  0x1a   :  { %69 = vmatpush.msra.mxu0 %v18_v25 }
  0x1b   :  { %89 = vmatpush.msra.mxu1 %v34_v26 }
  0x1c   :  { %70 = vmatpush.msra.mxu0 %v17_v27 }
  0x1d   :  { %90 = vmatpush.msra.mxu1 %v33_v28 }
  0x1e   :  { %71 = vmatpush.msra.mxu0 %v16_v29 }
  0x1f   :  { %91 = vmatpush.msra.mxu1 %v32_v30 }
  0x20   :  { %72 = vmatpush.msra.mxu0 %v15_v31 }
  0x21   :  { %92 = vmatpush.msra.mxu1 %v31_v32  ;;  %73 = vmatmul.f32.vlgmr.msra.gmra.mxu0 %v53_v33 }
  0x22   :  { %93 = vmatmul.f32.vlgmr.msra.gmra.mxu1 %v54_v34 }
  0x9e   :  { %v74_v36 = vpop.f32.mrf.mxu0 }
  0x9f   :  { %v94_v37 = vpop.f32.mrf.mxu1  ;;  %v75_v38 = vadd.f32 %v102_v35, %v74_v36 }
  0xa1   :  { %v95_v39 = vadd.f32 %v94_v37, %v75_v38 }
  0xa3   :  { %97 = vst [vmem:[%s231_s3] sm:$0x3] %v95_v39 }

</bundles_post_ra>
